<compile_context>
chip_gen: v6e
topology: v6e:2x2x1
jax: 0.10.0
libtpu: 0.0.40
codegen_flags: <defaults>
</compile_context>

<pallas_src>
import jax
import jax.numpy as jnp
from jax import lax
from jax.experimental import pallas as pl
from jax.experimental.pallas import tpu as pltpu

BN_EPS = 1e-5
LANE = 128
TK_LARGE = 256  # K tile for large K (good for v6e/v7x 256-wide MXU; use 128 on v5e)


def _round_up(x, m):
    return ((x + m - 1) // m) * m


# ---------------------------------------------------------------------------
# Kernel 1: tiled matmul (bf16 -> f32 accumulate) + per-M-tile BN partial stats
# ---------------------------------------------------------------------------
def _matmul_stats_kernel(a_ref, w_ref, y_ref, sum_ref, ssq_ref):
    k = pl.program_id(1)

    @pl.when(k == 0)
    def _():
        y_ref[...] = jnp.zeros_like(y_ref)

    # Accumulate straight into the resident f32 output block (no extra scratch).
    y_ref[...] += jnp.dot(a_ref[...], w_ref[...],
                          preferred_element_type=jnp.float32)

    @pl.when(k == pl.num_programs(1) - 1)
    def _():
        y = y_ref[...]                                    # (tm, Cpad) f32
        s = jnp.sum(y, axis=0, keepdims=True)             # (1, Cpad)
        q = jnp.sum(y * y, axis=0, keepdims=True)         # (1, Cpad)
        sum_ref[...] = s[None]                            # (1, 1, Cpad)
        ssq_ref[...] = q[None]


# ---------------------------------------------------------------------------
# Kernel 2: per-channel affine (folded BatchNorm) + ReLU, bf16 lane-dense output
# ---------------------------------------------------------------------------
def _bn_relu_kernel(y_ref, scale_ref, shift_ref, o_ref):
    y = y_ref[...]                                        # (tm, Cpad) f32
    o_ref[...] = jnp.maximum(y * scale_ref[...] + shift_ref[...],
                             0.0).astype(o_ref.dtype)


def conv_bn_relu(x, w, gamma, beta, *, stride, padding):
    """x: (B,H,W,Cin) NHWC (any float dtype), w: (kh,kw,Cin,Cout) f32.
    Conv (no bias; BN absorbs it) + train-mode BatchNorm + ReLU. Returns bf16 NHWC."""
    B, H, W, Cin = x.shape
    kh, kw, _, Cout = w.shape

    # ---- im2col glue (JAX), operands cast to bf16 for the MXU ----
    xp = jnp.pad(x, ((0, 0), (padding, padding), (padding, padding), (0, 0)))
    Ho = (H + 2 * padding - kh) // stride + 1
    Wo = (W + 2 * padding - kw) // stride + 1
    cols = [xp[:, i:i + stride * Ho:stride, j:j + stride * Wo:stride, :]
            for i in range(kh) for j in range(kw)]
    A = jnp.concatenate(cols, axis=-1).reshape(B * Ho * Wo, kh * kw * Cin)
    A = A.astype(jnp.bfloat16)
    Wm = w.reshape(kh * kw * Cin, Cout).astype(jnp.bfloat16)

    M = B * Ho * Wo
    K = kh * kw * Cin
    Cpad = _round_up(Cout, LANE)

    # K tiling: one full-K block when small (layer 1: K=9 -> 16), else 256-wide tiles.
    if K <= 512:
        tk = _round_up(K, 8)
    else:
        tk = TK_LARGE
    Kpad = _round_up(K, tk)
    nk = Kpad // tk

    # M tiling: 256-row tiles (fits VMEM with big margin on v5e/v6e/v7x).
    tm = 256 if M >= 256 else _round_up(M, 8)
    Mpad = _round_up(M, tm)
    nm = Mpad // tm

    A = jnp.pad(A, ((0, Mpad - M), (0, Kpad - K)))
    Wm = jnp.pad(Wm, ((0, Kpad - K), (0, Cpad - Cout)))

    y, psum, pssq = pl.pallas_call(
        _matmul_stats_kernel,
        out_shape=(
            jax.ShapeDtypeStruct((Mpad, Cpad), jnp.float32),   # conv output
            jax.ShapeDtypeStruct((nm, 1, Cpad), jnp.float32),  # per-tile sum
            jax.ShapeDtypeStruct((nm, 1, Cpad), jnp.float32),  # per-tile sum of squares
        ),
        grid_spec=pltpu.PrefetchScalarGridSpec(
            num_scalar_prefetch=0,
            grid=(nm, nk),
            in_specs=[
                pl.BlockSpec((tm, tk), lambda m, k: (m, k)),
                pl.BlockSpec((tk, Cpad), lambda m, k: (k, 0)),
            ],
            out_specs=(
                pl.BlockSpec((tm, Cpad), lambda m, k: (m, 0)),
                pl.BlockSpec((1, 1, Cpad), lambda m, k: (m, 0, 0)),
                pl.BlockSpec((1, 1, Cpad), lambda m, k: (m, 0, 0)),
            ),
        ),
        compiler_params=pltpu.CompilerParams(
            dimension_semantics=("parallel", "arbitrary")),
    )(A, Wm)

    # ---- tiny global BN stats reduction (nm x Cpad elements) in plain JAX ----
    total = jnp.sum(psum, axis=(0, 1))                 # (Cpad,)
    total_sq = jnp.sum(pssq, axis=(0, 1))              # (Cpad,)
    mean = total / M                                   # padded rows are zero -> exact
    var = jnp.maximum(total_sq / M - mean * mean, 0.0)  # biased batch variance
    gpad = jnp.pad(gamma, (0, Cpad - Cout))            # padded channels: gamma=0, beta=0
    bpad = jnp.pad(beta, (0, Cpad - Cout))
    scale = gpad * lax.rsqrt(var + BN_EPS)
    shift = bpad - mean * scale

    act = pl.pallas_call(
        _bn_relu_kernel,
        out_shape=jax.ShapeDtypeStruct((Mpad, Cpad), jnp.bfloat16),
        grid_spec=pltpu.PrefetchScalarGridSpec(
            num_scalar_prefetch=0,
            grid=(nm,),
            in_specs=[
                pl.BlockSpec((tm, Cpad), lambda m: (m, 0)),
                pl.BlockSpec((1, Cpad), lambda m: (0, 0)),
                pl.BlockSpec((1, Cpad), lambda m: (0, 0)),
            ],
            out_specs=pl.BlockSpec((tm, Cpad), lambda m: (m, 0)),
        ),
        compiler_params=pltpu.CompilerParams(dimension_semantics=("parallel",)),
    )(y, scale.reshape(1, Cpad), shift.reshape(1, Cpad))

    # Drop M/Cout padding before the next layer.
    return act[:M, :Cout].reshape(B, Ho, Wo, Cout)


# ---------------------------------------------------------------------------
# Fused AvgPool2d(7) + Flatten + Linear kernel (lane/sublane-dense, padded)
# ---------------------------------------------------------------------------
def _pool_fc_kernel(x_ref, w_ref, b_ref, o_ref):
    pooled = jnp.mean(x_ref[...].astype(jnp.float32), axis=1)   # (Bpad, C)
    o_ref[...] = (jnp.dot(pooled, w_ref[...],
                          preferred_element_type=jnp.float32)
                  + b_ref[...]).astype(o_ref.dtype)


def avgpool_flatten_linear(x, w, b, *, pool):
    """x: (B,H,W,C) with H==W==pool (AvgPool2d(pool) -> 1x1), then Linear(C, classes)."""
    B, H, W, C = x.shape
    assert H == pool and W == pool, "AvgPool2d(7) expects 7x7 feature map here"
    num_classes = w.shape[1]
    Bpad = _round_up(B, 8)
    Npad = _round_up(num_classes, LANE)

    xr = jnp.pad(x.reshape(B, H * W, C), ((0, Bpad - B), (0, 0), (0, 0)))
    wp = jnp.pad(w, ((0, 0), (0, Npad - num_classes)))
    bp = jnp.pad(b, (0, Npad - num_classes)).reshape(1, Npad)

    out = pl.pallas_call(
        _pool_fc_kernel,
        out_shape=jax.ShapeDtypeStruct((Bpad, Npad), jnp.float32),
        in_specs=[
            pl.BlockSpec(memory_space=pltpu.MemorySpace.VMEM),
            pl.BlockSpec(memory_space=pltpu.MemorySpace.VMEM),
            pl.BlockSpec(memory_space=pltpu.MemorySpace.VMEM),
        ],
        out_specs=pl.BlockSpec(memory_space=pltpu.MemorySpace.VMEM),
    )(xr, wp, bp)
    return out[:B, :num_classes]


# ---------------------------------------------------------------------------
# AllCNN model: deterministic synthetic parameters + forward
# ---------------------------------------------------------------------------
def init_params(key, n_channels=1, num_classes=10, filters_percentage=1.0):
    n1 = int(96 * filters_percentage)
    n2 = int(192 * filters_percentage)
    # (cin, cout, kernel, stride, padding) — mirrors AllCNN.features
    cfgs = [
        (n_channels, n1, 3, 1, 1),
        (n1, n1, 3, 1, 1),
        (n1, n2, 3, 2, 1),
        # Identity() (dropout=False)
        (n2, n2, 3, 1, 1),
        (n2, n2, 3, 1, 1),
        (n2, n2, 3, 2, 1),
        # Identity() (dropout=False)
        (n2, n2, 3, 1, 1),
        (n2, n2, 1, 1, 0),
    ]
    keys = jax.random.split(key, 3 * len(cfgs) + 2)
    ki = 0
    convs = []
    for (cin, cout, k, s, p) in cfgs:
        w = jax.random.normal(keys[ki], (k, k, cin, cout), jnp.float32) / jnp.sqrt(
            float(k * k * cin)); ki += 1
        gamma = 1.0 + 0.1 * jax.random.normal(keys[ki], (cout,), jnp.float32); ki += 1
        beta = 0.1 * jax.random.normal(keys[ki], (cout,), jnp.float32); ki += 1
        convs.append((w, gamma, beta, s, p))
    wl = jax.random.normal(keys[ki], (n2, num_classes), jnp.float32) / jnp.sqrt(float(n2)); ki += 1
    bl = 0.01 * jax.random.normal(keys[ki], (num_classes,), jnp.float32)
    return {"convs": convs, "linear": (wl, bl)}


def allcnn_forward(params, x_nchw):
    x = jnp.transpose(x_nchw, (0, 2, 3, 1))  # NCHW -> NHWC
    for (w, gamma, beta, s, p) in params["convs"]:
        x = conv_bn_relu(x, w, gamma, beta, stride=s, padding=p)
    wl, bl = params["linear"]
    return avgpool_flatten_linear(x, wl, bl, pool=7)


if __name__ == "__main__":
    key = jax.random.PRNGKey(0)
    kp, kx = jax.random.split(key)

    # small config: filters_percentage=1/6 -> n_filter1=16, n_filter2=32
    params = init_params(kp, n_channels=1, num_classes=10, filters_percentage=1.0 / 6.0)

    # PyTorch-style NCHW input: batch=2, channels=1, 28x28 (two stride-2 convs -> 7x7)
    x = jax.random.normal(kx, (2, 1, 28, 28), jnp.float32)

    out = allcnn_forward(params, x)
    out = jax.block_until_ready(out)
    assert out.shape == (2, 10), out.shape
    print("KERNEL_OK")
</pallas_src>

<mosaic_0001>
module attributes {stable_mosaic.version = 11 : i64} {
  func.func @_matmul_stats_kernel(%arg0: i32, %arg1: i32, %arg2: memref<256x16xbf16, #tpu.memory_space<vmem>>, %arg3: memref<16x128xbf16, #tpu.memory_space<vmem>>, %arg4: memref<256x128xf32, #tpu.memory_space<vmem>>, %arg5: memref<1x1x128xf32, #tpu.memory_space<vmem>>, %arg6: memref<1x1x128xf32, #tpu.memory_space<vmem>>) attributes {dimension_semantics = [#tpu.dimension_semantics<parallel>, #tpu.dimension_semantics<arbitrary>], iteration_bounds = array<i64: 7, 1>, scalar_prefetch = 0 : i64, scratch_operands = 0 : i64, tpu.core_type = #tpu.core_type<tc>, window_params = [{transform_indices = @transform_0, window_bounds = array<i64: 256, 16>}, {transform_indices = @transform_1, window_bounds = array<i64: 16, 128>}, {transform_indices = @transform_2, window_bounds = array<i64: 256, 128>}, {transform_indices = @transform_3, window_bounds = array<i64: 1, 1, 128>}, {transform_indices = @transform_4, window_bounds = array<i64: 1, 1, 128>}]} {
    %c0_i32 = arith.constant 0 : i32
    %0 = arith.cmpi eq, %arg1, %c0_i32 : i32
    %1 = arith.extui %0 : i1 to i32
    %c0_i32_0 = arith.constant 0 : i32
    %2 = arith.cmpi ne, %1, %c0_i32_0 : i32
    scf.if %2 {
      %cst_10 = arith.constant 0.000000e+00 : f32
      %12 = vector.broadcast %cst_10 : f32 to vector<256x128xf32>
      %c0_11 = arith.constant 0 : index
      %c0_12 = arith.constant 0 : index
      %13 = vector.load %arg4[%c0_11, %c0_12] : memref<256x128xf32, #tpu.memory_space<vmem>>, vector<256x128xf32>
      tpu.vector_store %arg4[%c0_11, %c0_12], %12 {strides = array<i32>} : memref<256x128xf32, #tpu.memory_space<vmem>>, vector<256x128xf32>,
    } else {
    }
    %c0 = arith.constant 0 : index
    %c0_1 = arith.constant 0 : index
    %3 = vector.load %arg4[%c0, %c0_1] : memref<256x128xf32, #tpu.memory_space<vmem>>, vector<256x128xf32>
    %c0_2 = arith.constant 0 : index
    %c0_3 = arith.constant 0 : index
    %4 = vector.load %arg2[%c0_2, %c0_3] : memref<256x16xbf16, #tpu.memory_space<vmem>>, vector<256x16xbf16>
    %c0_4 = arith.constant 0 : index
    %c0_5 = arith.constant 0 : index
    %5 = vector.load %arg3[%c0_4, %c0_5] : memref<16x128xbf16, #tpu.memory_space<vmem>>, vector<16x128xbf16>
    %cst = arith.constant dense<0.000000e+00> : vector<256x128xf32>
    %6 = tpu.matmul %4, %5, %cst {dimension_numbers = #tpu.dot_dimension_numbers<[1], [0], [0], [1], [0, 0, 1, 1], [], []>} : vector<256x16xbf16>, vector<16x128xbf16>, vector<256x128xf32> -> vector<256x128xf32>
    %7 = arith.addf %3, %6 : vector<256x128xf32>
    %c0_6 = arith.constant 0 : index
    %c0_7 = arith.constant 0 : index
    %8 = vector.load %arg4[%c0_6, %c0_7] : memref<256x128xf32, #tpu.memory_space<vmem>>, vector<256x128xf32>
    tpu.vector_store %arg4[%c0_6, %c0_7], %7 {strides = array<i32>} : memref<256x128xf32, #tpu.memory_space<vmem>>, vector<256x128xf32>,
    %c0_i32_8 = arith.constant 0 : i32
    %9 = arith.cmpi eq, %arg1, %c0_i32_8 : i32
    %10 = arith.extui %9 : i1 to i32
    %c0_i32_9 = arith.constant 0 : i32
    %11 = arith.cmpi ne, %10, %c0_i32_9 : i32
    scf.if %11 {
      %c0_10 = arith.constant 0 : index
      %c0_11 = arith.constant 0 : index
      %12 = vector.load %arg4[%c0_10, %c0_11] : memref<256x128xf32, #tpu.memory_space<vmem>>, vector<256x128xf32>
      %cst_12 = arith.constant dense<0.000000e+00> : vector<128xf32>
      %13 = vector.multi_reduction <add>, %12, %cst_12 [0] : vector<256x128xf32> to vector<128xf32>
      %14 = vector.shape_cast %13 : vector<128xf32> to vector<1x128xf32>
      %15 = arith.mulf %12, %12 : vector<256x128xf32>
      %cst_13 = arith.constant dense<0.000000e+00> : vector<128xf32>
      %16 = vector.multi_reduction <add>, %15, %cst_13 [0] : vector<256x128xf32> to vector<128xf32>
      %17 = vector.shape_cast %16 : vector<128xf32> to vector<1x128xf32>
      %18 = vector.shape_cast %14 : vector<1x128xf32> to vector<1x1x128xf32>
      %c0_14 = arith.constant 0 : index
      %c0_15 = arith.constant 0 : index
      %c0_16 = arith.constant 0 : index
      %19 = vector.load %arg5[%c0_14, %c0_15, %c0_16] : memref<1x1x128xf32, #tpu.memory_space<vmem>>, vector<1x1x128xf32>
      tpu.vector_store %arg5[%c0_14, %c0_15, %c0_16], %18 {strides = array<i32>} : memref<1x1x128xf32, #tpu.memory_space<vmem>>, vector<1x1x128xf32>,
      %20 = vector.shape_cast %17 : vector<1x128xf32> to vector<1x1x128xf32>
      %c0_17 = arith.constant 0 : index
      %c0_18 = arith.constant 0 : index
      %c0_19 = arith.constant 0 : index
      %21 = vector.load %arg6[%c0_17, %c0_18, %c0_19] : memref<1x1x128xf32, #tpu.memory_space<vmem>>, vector<1x1x128xf32>
      tpu.vector_store %arg6[%c0_17, %c0_18, %c0_19], %20 {strides = array<i32>} : memref<1x1x128xf32, #tpu.memory_space<vmem>>, vector<1x1x128xf32>,
    } else {
    }
    return
  }
  func.func @transform_0(%arg0: i32, %arg1: i32) -> (i32, i32) {
    %c0_i32 = arith.constant 0 : i32
    return %arg0, %arg1 : i32, i32
  }
  func.func @transform_1(%arg0: i32, %arg1: i32) -> (i32, i32) {
    %c0_i32 = arith.constant 0 : i32
    %c0_i32_0 = arith.constant 0 : i32
    return %arg1, %c0_i32 : i32, i32
  }
  func.func @transform_2(%arg0: i32, %arg1: i32) -> (i32, i32) {
    %c0_i32 = arith.constant 0 : i32
    %c0_i32_0 = arith.constant 0 : i32
    return %arg0, %c0_i32 : i32, i32
  }
  func.func @transform_3(%arg0: i32, %arg1: i32) -> (i32, i32, i32) {
    %c0_i32 = arith.constant 0 : i32
    %c0_i32_0 = arith.constant 0 : i32
    %c0_i32_1 = arith.constant 0 : i32
    return %arg0, %c0_i32, %c0_i32_0 : i32, i32, i32
  }
  func.func @transform_4(%arg0: i32, %arg1: i32) -> (i32, i32, i32) {
    %c0_i32 = arith.constant 0 : i32
    %c0_i32_0 = arith.constant 0 : i32
    %c0_i32_1 = arith.constant 0 : i32
    return %arg0, %c0_i32, %c0_i32_0 : i32, i32, i32
  }
}

</mosaic_0001>

<bundles_post_ra>
// kernel: tpu_custom_call.1
= control target key start
LH: loop header
LB: loop body
LE: loop exit
PB: predicated region body
PF: predicated region fallthrough
CT: control target
= control target key end

     0   :  { %10 = vsyncpa [#allocation3], 0  ;;  %s1767_s0 = inlined_call_operand.vmem [shape: bf16[1792,16], index: 0, kind: input, shape index: {}]   ;;  %s1768_s1 = inlined_call_operand.vmem [shape: bf16[16,128], index: 1, kind: input, shape index: {}]   ;;  %s1769_s2 = inlined_call_operand.hbm [shape: f32[1792,128], index: 2, kind: output, shape index: {0}]   ;;  %s1770_s3 = inlined_call_operand.hbm [shape: f32[7,1,128], index: 3, kind: output, shape index: {1}]   ;;  %s1771_s4 = inlined_call_operand.hbm [shape: f32[7,1,128], index: 4, kind: output, shape index: {2}]  }
   0x1   :  { %12 = vsyncpa [#allocation3 + $0x1], 0 }
   0x2   :  { %13 = vsyncpa [#allocation5], 0 }
   0x3   :  { %15 = vsyncpa [#allocation5 + $0x1], 0  ;;  %s1407_s15 = smov 0   ;;  %s1409_s16 = smov 0  }
   0x4   :  { %s1411_s17 = smov 0   ;;  %s1413_s18 = smov 0  }
   0x5   :  { %s1415_s19 = smov 0   ;;  %s1417_s20 = smov 0  }
   0x6 LB: > { %s1055_s21 = sadd.s32 4294967295, %s1375_s20   ;;  %s1772_s22 = sadd.s32 4294967294, %s1375_s20   ;;  %s1375_s20 = sphi %s1417_s20, %s21_s20   ;;  %s1371_s19 = sphi %s1415_s19, %s1780_s19   ;;  %s1367_s18 = sphi %s1413_s18, %s1779_s18   ;;  %s1363_s17 = sphi %s1411_s17, %s1778_s17   ;;  %s1359_s16 = sphi %s1409_s16, %s1777_s16   ;;  %s1355_s15 = sphi %s1407_s15, %s1776_s15  }
   0x7   : > { %s33_s23 = sadd.s32 1, %s1371_s19  ;;  %s94_s24 = sadd.s32 1, %s1363_s17 }
   0x8   : > { %p35_p0 = scmp.ge.s32.totalorder %s33_s23, 7  ;;  %p104_p1 = scmp.ne.s32.totalorder %s1363_s17, %s1359_s16 }
   0x9   : > { %p105_p2 = scmp.eq.s32.totalorder %s1055_s21, 6  ;;  %p110_p3 = scmp.ne.s32.totalorder %s1359_s16, %s1355_s15 }
   0xa   : > { %s1782_s23 = smov (%p35_p0, %s33_s23), 0  ;;  %p111_p5 = scmp.eq.s32.totalorder %s1772_s22, 6 }
   0xb   : > { %p1449_p4 = por %p105_p2, %p104_p1  ;;  %s91_s26 = ssub.s32 %s1371_s19, %s1782_s23 }
   0xc   : > { %p1060_p6 = scmp.ge.s32.totalorder %s1375_s20, 1  ;;  %p92_p7 = scmp.eq.s32.totalorder %s91_s26, 0 }
   0xd   : > { %p1458_p8 = por %p111_p5, %p110_p3  ;;  %p202_p9 = scmp.lt.s32.totalorder %s1375_s20, 8 }
   0xe   : > { %s1464_s28 = scalar_select %p92_p7, %s1363_s17, %s94_s24  }
   0xf   : > { %p203_p10 = pnand %p1060_p6, %p202_p9 }
  0x10   : > { %s1062_s5 = sshll.u32 (!%p203_p10), %s1367_s18, 5  ;;  %s1508_s10 = sand.u32 (!%p203_p10), 1, %s1359_s16  }
  0x11   : > { %206 = sbr.rel (%p203_p10) target bundleno = 344 (0x158), region = 28  ;;  %p245_p11 = scmp.lt.s32.totalorder (!%p203_p10), %s1062_s5, 223 }
  0x12   : > { %s1061_s11 = sshll.u32 (!%p203_p10), %s1508_s10, 8  ;;  %s1104_s13 = sshll.u32 (!%p203_p10), %s1367_s18, 12 }
  0x13   : > { %s1511_s12 = scalar_lea.vmem (!%p203_p10), [#allocation2], %s1061_s11  ;;  %s1594_s29 = scalar_lea.hbm (!%p203_p10), %s1769_s2, %s1104_s13 }
  0x14   : > { %s888_s14 = sshll.u32 (!%p203_p10), %s1511_s12, 4  ;;  %s867_s30 = scalar_lea.sflag (!%p203_p10), [#allocation3], %s1508_s10  ;;  %s1596_s14 = int_to_ptr.vmem [resolvable:$true] %s888_s14 }
  0x16   : > { %v1226_v0 = vld [vmem:[%s1768_s1] sm:$0xff]   ;;  %s1784_s5 = smov (!%p245_p11, %s1062_s5), 223  ;;  %vm449_vm0 = vcmask 130048  }
  0x17   : > { %1122 = vmatprep.subr.bf16.mxu0 %v1226_v0  ;;  %1156 = vmatprep.subr.bf16.mxu1 %v1226_v0  ;;  %s1063_s6 = sshll.u32 %s1784_s5, 2  ;;  %s1243_s5 = scalar_lea.vmem %s1596_s14, 4096 }
  0x18   : > { %1123 = vmatpush3.bf16.msra.mxu0 %v1226_v0  ;;  %1157 = vmatpush3.bf16.msra.mxu1 %v1226_v0  ;;  %s1473_s9 = scalar_lea.vmem %s1767_s0, %s1063_s6  ;;  %p1244_p12 = scmp.ne.s32.totalorder %s1596_s14, %s1243_s5 }
  0x19   : > { %v1227_v1 = vld [vmem:[%s1473_s9] sm:$0xff]   ;;  %v1228_v2 = vld [vmem:[%s1473_s9 + $0x8] sm:$0xff]   ;;  %v1229_v3 = vld [vmem:[%s1473_s9 + $0x10] sm:$0xff]   ;;  %s1377_s6 = smov [#allocation2]  }
  0x1a   : > { %1124 = vmatprep.mubr.msk.bf16.mxu0 %vm449_vm0, %v1227_v1  ;;  %v1230_v4 = vld [vmem:[%s1473_s9 + $0x18] sm:$0xff]   ;;  %v1231_v5 = vld [vmem:[%s1473_s9 + $0x20] sm:$0xff]   ;;  %v1236_v7 = vld [vmem:[%s1473_s9 + $0x48] sm:$0xff]   ;;  %p1245_p13 = pnand %p1244_p12, %p1449_p4  ;;  %s1247_s7 = sshll.u32 %s1377_s6, 4  ;;  %s1248_s7 = int_to_ptr.vmem [resolvable:$false] %s1247_s7 }
  0x1b   : > { %1125 = vmatmul.mubr.msk.bf16.vlgmr.msra.gmra.mxu0 %vm449_vm0, %v1228_v2  ;;  %v1235_v6 = vld [vmem:[%s1473_s9 + $0x40] sm:$0xff]   ;;  %v1237_v8 = vld [vmem:[%s1473_s9 + $0x50] sm:$0xff]   ;;  %v1232_v9 = vld [vmem:[%s1473_s9 + $0x28] sm:$0xff]   ;;  %s1249_s8 = scalar_lea.vmem %s1248_s7, 8192  ;;  %p1250_p1 = scmp.lt.s32.totalorder %s1596_s14, %s1248_s7 }
  0x1c   : > { %1128 = vmatprep.mubr.msk.bf16.mxu0 %vm449_vm0, %v1229_v3  ;;  %1140 = vmatprep.mubr.msk.bf16.mxu1 %vm449_vm0, %v1235_v6  ;;  %v1238_v10 = vld [vmem:[%s1473_s9 + $0x58] sm:$0xff]   ;;  %v1233_v11 = vld [vmem:[%s1473_s9 + $0x30] sm:$0xff]   ;;  %v1239_v12 = vld [vmem:[%s1473_s9 + $0x60] sm:$0xff]   ;;  %p1246_p0 = pneg %p1245_p13  ;;  %p1251_p2 = scmp.lt.s32.totalorder %s1249_s8, %s1243_s5 }
  0x1d   : > { %1141 = vmatmul.mubr.msk.bf16.vlgmr.msra.gmra.mxu1 %vm449_vm0, %v1236_v7  ;;  %v1234_v13 = vld [vmem:[%s1473_s9 + $0x38] sm:$0xff]   ;;  %v1240_v14 = vld [vmem:[%s1473_s9 + $0x68] sm:$0xff]   ;;  %v1241_v15 = vld [vmem:[%s1473_s9 + $0x70] sm:$0xff]  }
  0x1e   : > { %1144 = vmatprep.mubr.msk.bf16.mxu1 %vm449_vm0, %v1237_v8  ;;  %v1242_v16 = vld [vmem:[%s1473_s9 + $0x78] sm:$0xff]   ;;  %p1252_p3 = por %p1251_p2, %p1250_p1 }
  0x20   : > { %p1253_p5 = pnand %p1252_p3, %p1246_p0 }
  0x23   : > { %1129 = vmatmul.mubr.msk.bf16.gmra.mxu0 %vm449_vm0, %v1230_v4 }
  0x24   : > { %1132 = vmatprep.mubr.msk.bf16.mxu0 %vm449_vm0, %v1231_v5 }
  0x25   : > { %1145 = vmatmul.mubr.msk.bf16.gmra.mxu1 %vm449_vm0, %v1238_v10 }
  0x26   : > { %1148 = vmatprep.mubr.msk.bf16.mxu1 %vm449_vm0, %v1239_v12 }
  0x2b   : > { %1133 = vmatmul.mubr.msk.bf16.gmra.mxu0 %vm449_vm0, %v1232_v9 }
  0x2c   : > { %1136 = vmatprep.mubr.msk.bf16.mxu0 %vm449_vm0, %v1233_v11 }
  0x2d   : > { %1149 = vmatmul.mubr.msk.bf16.gmra.mxu1 %vm449_vm0, %v1240_v14 }
  0x2e   : > { %1152 = vmatprep.mubr.msk.bf16.mxu1 %vm449_vm0, %v1241_v15 }
  0x33   : > { %1137 = vmatmul.mubr.msk.bf16.gmra.mxu0 %vm449_vm0, %v1234_v13 }
  0x35   : > { %1153 = vmatmul.mubr.msk.bf16.gmra.mxu1 %vm449_vm0, %v1242_v16 }
  0xdb   : > { %v1126_v17 = vpop.f32.mrf.mxu0 }
  0xdc   : > { %693 = vst [vmem:[%s1511_s12 + $0x10] sm:$0xff] %v1126_v17  ;;  %v797_v28 = vmul.f32 %v1126_v17, %v1126_v17 }
  0xdd   : > { %v532_v18 = vpop.f32.mrf.mxu0  ;;  %v1516_v23 = vpop.f32.mrf.mxu1 }
  0xde   : > { %691 = vst [vmem:[%s1511_s12] sm:$0xff] %v532_v18  ;;  %v795_v21 = vmul.f32 %v532_v18, %v532_v18  ;;  %709 = vst [vmem:[%s1511_s12 + $0x90] sm:$0xff] %v1516_v23 }
  0xdf   : > { %v1127_v19 = vpop.f32.mrf.mxu0  ;;  %v1519_v27 = vpop.f32.mrf.mxu1 }
  0xe0   : > { %694 = vst [vmem:[%s1511_s12 + $0x18] sm:$0xff] %v1127_v19  ;;  %v798_v33 = vmul.f32 %v1127_v19, %v1127_v19  ;;  %707 = vst [vmem:[%s1511_s12 + $0x80] sm:$0xff] %v1519_v27 }
  0xe1   : > { %v535_v20 = vpop.f32.mrf.mxu0  ;;  %v1524_v32 = vpop.f32.mrf.mxu1 }
  0xe2   : > { %692 = vst [vmem:[%s1511_s12 + $0x8] sm:$0xff] %v535_v20  ;;  %v758_v24 = vadd.f32 %v535_v20, %v532_v18  ;;  %v796_v25 = vmul.f32 %v535_v20, %v535_v20  ;;  %710 = vst [vmem:[%s1511_s12 + $0x98] sm:$0xff] %v1524_v32 }
  0xe3   : > { %v1130_v22 = vpop.f32.mrf.mxu0  ;;  %v1529_v37 = vpop.f32.mrf.mxu1 }
  0xe4   : > { %v759_v29 = vadd.f32 %v1126_v17, %v758_v24  ;;  %v827_v30 = vadd.f32 %v796_v25, %v795_v21  ;;  %697 = vst [vmem:[%s1511_s12 + $0x30] sm:$0xff] %v1130_v22  ;;  %708 = vst [vmem:[%s1511_s12 + $0x88] sm:$0xff] %v1529_v37  ;;  %v801_v48 = vmul.f32 %v1130_v22, %v1130_v22 }
  0xe5   : > { %v548_v26 = vpop.f32.mrf.mxu0  ;;  %v1534_v42 = vpop.f32.mrf.mxu1 }
  0xe6   : > { %v828_v34 = vadd.f32 %v827_v30, %v797_v28  ;;  %695 = vst [vmem:[%s1511_s12 + $0x20] sm:$0xff] %v548_v26  ;;  %v760_v35 = vadd.f32 %v1127_v19, %v759_v29  ;;  %v799_v39 = vmul.f32 %v548_v26, %v548_v26  ;;  %713 = vst [vmem:[%s1511_s12 + $0xb0] sm:$0xff] %v1534_v42 }
  0xe7   : > { %v1131_v31 = vpop.f32.mrf.mxu0  ;;  %v1539_v47 = vpop.f32.mrf.mxu1 }
  0xe8   : > { %v761_v38 = vadd.f32 %v760_v35, %v548_v26  ;;  %v829_v40 = vadd.f32 %v828_v34, %v798_v33  ;;  %698 = vst [vmem:[%s1511_s12 + $0x38] sm:$0xff] %v1131_v31  ;;  %v802_v53 = vmul.f32 %v1131_v31, %v1131_v31  ;;  %711 = vst [vmem:[%s1511_s12 + $0xa0] sm:$0xff] %v1539_v47 }
  0xe9   : > { %v551_v36 = vpop.f32.mrf.mxu0  ;;  %v1544_v52 = vpop.f32.mrf.mxu1  ;;  %v811_v33 = vmul.f32 %v1519_v27, %v1519_v27 }
  0xea   : > { %v830_v43 = vadd.f32 %v829_v40, %v799_v39  ;;  %696 = vst [vmem:[%s1511_s12 + $0x28] sm:$0xff] %v551_v36  ;;  %v762_v44 = vadd.f32 %v761_v38, %v551_v36  ;;  %v800_v45 = vmul.f32 %v551_v36, %v551_v36  ;;  %714 = vst [vmem:[%s1511_s12 + $0xb8] sm:$0xff] %v1544_v52 }
  0xeb   : > { %v1134_v41 = vpop.f32.mrf.mxu0  ;;  %v1549_v57 = vpop.f32.mrf.mxu1  ;;  %v812_v38 = vmul.f32 %v1529_v37, %v1529_v37 }
  0xec   : > { %v763_v49 = vadd.f32 %v1130_v22, %v762_v44  ;;  %v831_v50 = vadd.f32 %v830_v43, %v800_v45  ;;  %701 = vst [vmem:[%s1511_s12 + $0x50] sm:$0xff] %v1134_v41  ;;  %712 = vst [vmem:[%s1511_s12 + $0xa8] sm:$0xff] %v1549_v57  ;;  %v805_v4 = vmul.f32 %v1134_v41, %v1134_v41 }
  0xed   : > { %v564_v46 = vpop.f32.mrf.mxu0  ;;  %v1554_v62 = vpop.f32.mrf.mxu1 }
  0xee   : > { %v832_v54 = vadd.f32 %v831_v50, %v801_v48  ;;  %699 = vst [vmem:[%s1511_s12 + $0x40] sm:$0xff] %v564_v46  ;;  %v764_v55 = vadd.f32 %v1131_v31, %v763_v49  ;;  %v803_v59 = vmul.f32 %v564_v46, %v564_v46  ;;  %717 = vst [vmem:[%s1511_s12 + $0xd0] sm:$0xff] %v1554_v62 }
  0xef   : > { %v1135_v51 = vpop.f32.mrf.mxu0  ;;  %v1559_v3 = vpop.f32.mrf.mxu1 }
  0xf0   : > { %v765_v58 = vadd.f32 %v764_v55, %v564_v46  ;;  %v833_v60 = vadd.f32 %v832_v54, %v802_v53  ;;  %702 = vst [vmem:[%s1511_s12 + $0x58] sm:$0xff] %v1135_v51  ;;  %v806_v9 = vmul.f32 %v1135_v51, %v1135_v51  ;;  %715 = vst [vmem:[%s1511_s12 + $0xc0] sm:$0xff] %v1559_v3 }
  0xf1   : > { %v567_v56 = vpop.f32.mrf.mxu0  ;;  %v1564_v8 = vpop.f32.mrf.mxu1 }
  0xf2   : > { %v834_v63 = vadd.f32 %v833_v60, %v803_v59  ;;  %700 = vst [vmem:[%s1511_s12 + $0x48] sm:$0xff] %v567_v56  ;;  %v766_v0 = vadd.f32 %v765_v58, %v567_v56  ;;  %v804_v1 = vmul.f32 %v567_v56, %v567_v56  ;;  %718 = vst [vmem:[%s1511_s12 + $0xd8] sm:$0xff] %v1564_v8 }
  0xf3   : > { %v1138_v61 = vpop.f32.mrf.mxu0  ;;  %v1569_v13 = vpop.f32.mrf.mxu1 }
  0xf4   : > { %v767_v5 = vadd.f32 %v1134_v41, %v766_v0  ;;  %v835_v6 = vadd.f32 %v834_v63, %v804_v1  ;;  %705 = vst [vmem:[%s1511_s12 + $0x70] sm:$0xff] %v1138_v61  ;;  %716 = vst [vmem:[%s1511_s12 + $0xc8] sm:$0xff] %v1569_v13  ;;  %v809_v22 = vmul.f32 %v1138_v61, %v1138_v61 }
  0xf5   : > { %v580_v2 = vpop.f32.mrf.mxu0  ;;  %v1574_v17 = vpop.f32.mrf.mxu1 }
  0xf6   : > { %v836_v10 = vadd.f32 %v835_v6, %v805_v4  ;;  %703 = vst [vmem:[%s1511_s12 + $0x60] sm:$0xff] %v580_v2  ;;  %v768_v11 = vadd.f32 %v1135_v51, %v767_v5  ;;  %v807_v15 = vmul.f32 %v580_v2, %v580_v2  ;;  %721 = vst [vmem:[%s1511_s12 + $0xf0] sm:$0xff] %v1574_v17 }
  0xf7   : > { %v1139_v7 = vpop.f32.mrf.mxu0  ;;  %v1579_v21 = vpop.f32.mrf.mxu1 }
  0xf8   : > { %v769_v14 = vadd.f32 %v768_v11, %v580_v2  ;;  %v837_v16 = vadd.f32 %v836_v10, %v806_v9  ;;  %706 = vst [vmem:[%s1511_s12 + $0x78] sm:$0xff] %v1139_v7  ;;  %v810_v28 = vmul.f32 %v1139_v7, %v1139_v7  ;;  %719 = vst [vmem:[%s1511_s12 + $0xe0] sm:$0xff] %v1579_v21 }
  0xf9   : > { %v583_v12 = vpop.f32.mrf.mxu0  ;;  %v1585_v26 = vpop.f32.mrf.mxu1 }
  0xfa   : > { %v838_v18 = vadd.f32 %v837_v16, %v807_v15  ;;  %704 = vst [vmem:[%s1511_s12 + $0x68] sm:$0xff] %v583_v12  ;;  %v770_v19 = vadd.f32 %v769_v14, %v583_v12  ;;  %v808_v20 = vmul.f32 %v583_v12, %v583_v12  ;;  %722 = vst [vmem:[%s1511_s12 + $0xf8] sm:$0xff] %v1585_v26 }
  0xfb   : > { %v1589_v31 = vpop.f32.mrf.mxu1 }
  0xfc   : > { %v771_v24 = vadd.f32 %v1138_v61, %v770_v19  ;;  %v839_v25 = vadd.f32 %v838_v18, %v808_v20  ;;  %720 = vst [vmem:[%s1511_s12 + $0xe8] sm:$0xff] %v1589_v31 }
  0xfe   : > { %v840_v29 = vadd.f32 %v839_v25, %v809_v22  ;;  %v772_v30 = vadd.f32 %v1139_v7, %v771_v24 }
 0x100   : > { %v773_v34 = vadd.f32 %v772_v30, %v1519_v27  ;;  %v841_v35 = vadd.f32 %v840_v29, %v810_v28 }
 0x102   : > { %v774_v36 = vadd.f32 %v773_v34, %v1529_v37  ;;  %v842_v39 = vadd.f32 %v841_v35, %v811_v33 }
 0x103   : > { %1256 = shalt.err (!%p1253_p5)
}
 0x104   : > { %s1257_s9 = scalar_lea.hbm %s1594_s29, 4096  ;;  %s1261_s13 = scalar_lea.hbm %s1769_s2, 28672 }
 0x105   : > { %p1258_p6 = scmp.ne.s32.totalorder %s1594_s29, %s1257_s9  ;;  %p1262_p10 = scmp.lt.s32.totalorder %s1594_s29, %s1769_s2 }
 0x106   : > { %p1263_p11 = scmp.lt.s32.totalorder %s1261_s13, %s1257_s9 }
 0x107   : > { %p1259_p7 = pnand %p1258_p6, %p1449_p4 }
 0x108   : > { %p1264_p12 = por %p1263_p11, %p1262_p10 }
 0x109   : > { %p1260_p9 = pneg %p1259_p7 }
 0x10b   : > { %p1265_p13 = pnand %p1264_p12, %p1260_p9 }
 0x10d   : > { %1268 = shalt.err (!%p1265_p13)
}
 0x10e   : > { %s1378_s5 = smov 128   ;;  %s1379_s6 = smov 8   ;;  %v813_v27 = vmul.f32 %v1516_v23, %v1516_v23  ;;  %v843_v37 = vadd.f32 %v842_v39, %v812_v38  ;;  %v775_v40 = vadd.f32 %v1516_v23, %v774_v36  ;;  %v814_v43 = vmul.f32 %v1524_v32, %v1524_v32 }
 0x10f   : > { %1158 = dma.vmem_to_hbm [thread:$0]  (%p1449_p4), %s1596_s14, 4096, %s1594_s29, %s867_s30, %s1378_s5, %s1378_s5, %s1379_s6   ;;  %v815_v46 = vmul.f32 %v1539_v47, %v1539_v47  ;;  %v816_v50 = vmul.f32 %v1549_v57, %v1549_v57  ;;  %v817_v53 = vmul.f32 %v1534_v42, %v1534_v42  ;;  %v818_v55 = vmul.f32 %v1544_v52, %v1544_v52 }
 0x110   : > { %v776_v41 = vadd.f32 %v1524_v32, %v775_v40  ;;  %v844_v44 = vadd.f32 %v843_v37, %v813_v27  ;;  %v819_v58 = vmul.f32 %v1559_v3, %v1559_v3  ;;  %v820_v60 = vmul.f32 %v1569_v13, %v1569_v13  ;;  %s1675_s14 = sand.u32 1, %s1055_s21   ;;  %s1100_s29 = sshll.u32 %s1367_s18, 4 }
 0x111   : > { %v821_v63 = vmul.f32 %v1554_v62, %v1554_v62  ;;  %v822_v1 = vmul.f32 %v1564_v8, %v1564_v8  ;;  %v823_v4 = vmul.f32 %v1579_v21, %v1579_v21  ;;  %v824_v7 = vmul.f32 %v1589_v31, %v1589_v31  ;;  %s237_s30 = scalar_lea.vmem [#allocation4], %s1508_s10  ;;  %s243_s8 = scalar_lea.vmem [#allocation6], %s1508_s10 }
 0x112   : > { %v777_v45 = vadd.f32 %v776_v41, %v1539_v47  ;;  %v845_v48 = vadd.f32 %v844_v44, %v814_v43  ;;  %v826_v12 = vmul.f32 %v1585_v26, %v1585_v26  ;;  %s904_s7 = sshll.u32 %s237_s30, 4  ;;  %s917_s9 = sshll.u32 %s243_s8, 4  ;;  %s1687_s7 = int_to_ptr.vmem [resolvable:$true] %s904_s7  ;;  %s1694_s9 = int_to_ptr.vmem [resolvable:$true] %s917_s9 }
 0x113   : > { %s1685_s13 = scalar_lea.hbm %s1770_s3, %s1100_s29  ;;  %s1692_s24 = scalar_lea.hbm %s1771_s4, %s1100_s29 }
 0x114   : > { %v778_v49 = vadd.f32 %v777_v45, %v1549_v57  ;;  %v846_v51 = vadd.f32 %v845_v48, %v815_v46  ;;  %s872_s26 = scalar_lea.sflag [#allocation5], %s1675_s14  ;;  %s1269_s5 = scalar_lea.vmem %s1687_s7, 16 }
 0x115   : > { %p1270_p0 = scmp.ne.s32.totalorder %s1687_s7, %s1269_s5  ;;  %s1380_s6 = smov [#allocation4]  }
 0x116   : > { %v779_v23 = vadd.f32 %v1534_v42, %v778_v49  ;;  %v847_v54 = vadd.f32 %v846_v51, %v816_v50  ;;  %s1273_s11 = sshll.u32 %s1380_s6, 4  ;;  %s1274_s11 = int_to_ptr.vmem [resolvable:$false] %s1273_s11 }
 0x117   : > { %p1271_p1 = pnand %p1270_p0, %p1449_p4  ;;  %s1275_s12 = scalar_lea.vmem %s1274_s11, 32 }
 0x118   : > { %v780_v32 = vadd.f32 %v1544_v52, %v779_v23  ;;  %v848_v56 = vadd.f32 %v847_v54, %v817_v53  ;;  %p1276_p3 = scmp.lt.s32.totalorder %s1687_s7, %s1274_s11  ;;  %p1277_p5 = scmp.lt.s32.totalorder %s1275_s12, %s1269_s5 }
 0x119   : > { %p1272_p2 = pneg %p1271_p1 }
 0x11a   : > { %v781_v47 = vadd.f32 %v780_v32, %v1559_v3  ;;  %v849_v59 = vadd.f32 %v848_v56, %v818_v55  ;;  %p1278_p6 = por %p1277_p5, %p1276_p3 }
 0x11c   : > { %v782_v57 = vadd.f32 %v781_v47, %v1569_v13  ;;  %v850_v61 = vadd.f32 %v849_v59, %v819_v58  ;;  %p1279_p7 = pnand %p1278_p6, %p1272_p2 }
 0x11e   : > { %v783_v42 = vadd.f32 %v1554_v62, %v782_v57  ;;  %v851_v0 = vadd.f32 %v850_v61, %v820_v60 }
 0x120   : > { %v784_v52 = vadd.f32 %v1564_v8, %v783_v42  ;;  %v852_v2 = vadd.f32 %v851_v0, %v821_v63  ;;  %v825_v8 = vmul.f32 %v1574_v17, %v1574_v17 }
 0x122   : > { %v785_v3 = vadd.f32 %v784_v52, %v1579_v21  ;;  %v853_v5 = vadd.f32 %v852_v2, %v822_v1 }
 0x124   : > { %v786_v6 = vadd.f32 %v785_v3, %v1589_v31  ;;  %v854_v62 = vadd.f32 %v853_v5, %v823_v4 }
 0x126   : > { %v787_v9 = vadd.f32 %v1574_v17, %v786_v6  ;;  %v855_v10 = vadd.f32 %v854_v62, %v824_v7 }
 0x128   : > { %v788_v11 = vadd.f32 %v1585_v26, %v787_v9  ;;  %v856_v13 = vadd.f32 %v855_v10, %v825_v8 }
 0x12a   : > { %v789_v14 = vrot.slane %v788_v11, 4  ;;  %v857_v15 = vadd.f32 %v856_v13, %v826_v12 }
 0x12c   : > { %v790_v16 = vadd.f32 %v789_v14, %v788_v11  ;;  %v858_v18 = vrot.slane %v857_v15, 4 }
 0x12e   : > { %v791_v19 = vrot.slane %v790_v16, 2  ;;  %v859_v20 = vadd.f32 %v858_v18, %v857_v15 }
 0x130   : > { %v792_v21 = vadd.f32 %v791_v19, %v790_v16  ;;  %v860_v17 = vrot.slane %v859_v20, 2 }
 0x132   : > { %v793_v22 = vrot.slane %v792_v21, 1  ;;  %v861_v24 = vadd.f32 %v860_v17, %v859_v20 }
 0x134   : > { %v794_v25 = vadd.f32 %v793_v22, %v792_v21  ;;  %v862_v26 = vrot.slane %v861_v24, 1 }
 0x136   : > { %864 = vst [vmem:[%s237_s30] sm:$0x1] %v794_v25  ;;  %v863_v28 = vadd.f32 %v862_v26, %v861_v24 }
 0x137   : > { %1282 = shalt.err (!%p1279_p7)
}
 0x138   : > { %s1283_s29 = scalar_lea.hbm %s1685_s13, 16  ;;  %s1287_s21 = scalar_lea.hbm %s1770_s3, 112 }
 0x139   : > { %p1284_p9 = scmp.ne.s32.totalorder %s1685_s13, %s1283_s29  ;;  %p1288_p12 = scmp.lt.s32.totalorder %s1685_s13, %s1770_s3 }
 0x13a   : > { %p1289_p13 = scmp.lt.s32.totalorder %s1287_s21, %s1283_s29 }
 0x13b   : > { %p1285_p10 = pnand %p1284_p9, %p1449_p4 }
 0x13c   : > { %p1290_p0 = por %p1289_p13, %p1288_p12 }
 0x13d   : > { %p1286_p11 = pneg %p1285_p10 }
 0x13f   : > { %p1291_p1 = pnand %p1290_p0, %p1286_p11 }
 0x141   : > { %1294 = shalt.err (!%p1291_p1)
}
 0x142   : > { %1159 = dma.vmem_to_hbm [thread:$0]  (%p1449_p4), %s1687_s7, 16, %s1685_s13, %s872_s26   ;;  %865 = vst [vmem:[%s243_s8] sm:$0x1] %v863_v28 }
 0x143   : > { %s1295_s22 = scalar_lea.vmem %s1694_s9, 16  ;;  %s1381_s5 = smov [#allocation6]  }
 0x144   : > { %p1296_p2 = scmp.ne.s32.totalorder %s1694_s9, %s1295_s22  ;;  %s1299_s11 = sshll.u32 %s1381_s5, 4  ;;  %s1300_s11 = int_to_ptr.vmem [resolvable:$false] %s1299_s11 }
 0x145   : > { %s1301_s12 = scalar_lea.vmem %s1300_s11, 32  ;;  %p1302_p6 = scmp.lt.s32.totalorder %s1694_s9, %s1300_s11 }
 0x146   : > { %p1297_p3 = pnand %p1296_p2, %p1449_p4  ;;  %p1303_p7 = scmp.lt.s32.totalorder %s1301_s12, %s1295_s22 }
 0x148   : > { %p1298_p5 = pneg %p1297_p3  ;;  %p1304_p9 = por %p1303_p7, %p1302_p6 }
 0x14a   : > { %p1305_p10 = pnand %p1304_p9, %p1298_p5 }
 0x14c   : > { %1308 = shalt.err (!%p1305_p10)
}
 0x14d   : > { %s1309_s10 = scalar_lea.hbm %s1692_s24, 16  ;;  %s1313_s13 = scalar_lea.hbm %s1771_s4, 112 }
 0x14e   : > { %p1310_p11 = scmp.ne.s32.totalorder %s1692_s24, %s1309_s10  ;;  %p1314_p0 = scmp.lt.s32.totalorder %s1692_s24, %s1771_s4 }
 0x14f   : > { %p1315_p1 = scmp.lt.s32.totalorder %s1313_s13, %s1309_s10 }
 0x150   : > { %p1311_p12 = pnand %p1310_p11, %p1449_p4 }
 0x151   : > { %p1316_p2 = por %p1315_p1, %p1314_p0 }
 0x152   : > { %p1312_p13 = pneg %p1311_p12 }
 0x154   : > { %p1317_p3 = pnand %p1316_p2, %p1312_p13 }
 0x156   : > { %1320 = shalt.err (!%p1317_p3)
}
 0x157   : > { %1160 = dma.vmem_to_hbm [thread:$0]  (%p1449_p4), %s1694_s9, 16, %s1692_s24, %s872_s26  }
 0x158 PF: > { %p1174_p5 = scmp.ge.s32.totalorder %s1375_s20, 2  ;;  %s929_s18 = sand.u32 1, %s1355_s15  }
 0x159   : > { %s930_s21 = scalar_lea.sflag [#allocation3], %s929_s18 }
 0x15a   : > { %p1165_p6 = pnand %p1174_p5, %p1458_p8 }
 0x15c   : > { %p1166_p7 = pneg %p1165_p6 }
 0x15e   : > { %1346 = dma.done.wait (%p1166_p7), %s930_s21, 4096  }
 0x15f   : > { %1348 = vsyncadd (%p1166_p7), %s930_s21, 4294963200  ;;  %s1775_s6 = sadd.s32 4294967294, %s1375_s20  }
 0x160   : > { %s938_s25 = sand.u32 1, %s1775_s6  }
 0x161   : > { %s939_s22 = scalar_lea.sflag [#allocation5], %s938_s25 }
 0x162   : > { %1350 = dma.done.wait (%p1166_p7), %s939_s22, 32  }
 0x163   : > { %1352 = vsyncadd (%p1166_p7), %s939_s22, 4294967264  ;;  %s21_s20 = sadd.s32 1, %s1375_s20   ;;  %s1776_s15 = smov %s1359_s16 }
 0x164   : > { %p18_p4 = scmp.ge.s32.totalorder %s21_s20, 9   ;;  %s1777_s16 = smov %s1363_s17 }
 0x165   : > { %s1778_s17 = smov %s1464_s28  ;;  %s1779_s18 = smov %s1371_s19 }
 0x166   : > { %s1780_s19 = smov %s1782_s23  ;;  %20 = sbr.rel (!%p18_p4) target bundleno = 6 (0x6), region = 106 }
 0x16b   :  { %951 = vsyncpa [#allocation3], 1 }
 0x16c   :  { %953 = vsyncpa [#allocation3 + $0x1], 1 }
 0x16d   :  { %954 = vsyncpa [#allocation5], 1 }
 0x16e   :  { %956 = vsyncpa [#allocation5 + $0x1], 1 }

</bundles_post_ra>
